<compile_context>
chip_gen: v7x
topology: tpu7x:2x2x1
jax: 0.10.0
libtpu: 0.0.40
codegen_flags: <defaults>
</compile_context>

<pallas_src>
from functools import partial

import jax
import jax.numpy as jnp
from jax.experimental import pallas as pl
from jax.experimental.pallas import tpu as pltpu

LANE = 128              # vreg lane width
SUBLANE = 8             # vreg sublane count
MAX_BATCH_TILE = 1024   # rows per grid step (per-step overhead amortization)
MIN_ROWS_FOR_SPLIT = 256  # force >=2 grid steps (v7x: 2 TensorCores) above this


def _round_up(n, m):
    return ((n + m - 1) // m) * m


def _ceil_div(a, b):
    return -(-a // b)


def _dqn_kernel(x_ref, w1_ref, wp_ref, bp_ref, o_ref):
    """4 MXU matmuls + VPU bias/ReLU on one batch tile; weights stay resident."""
    n_actions = o_ref.shape[-1]
    b = bp_ref[...]                                    # (4, H) resident biases, f32

    h = jnp.dot(x_ref[...], w1_ref[...], preferred_element_type=jnp.float32)
    h = jnp.maximum(h + b[0:1, :], 0.0)
    h = jnp.dot(h, wp_ref[0], preferred_element_type=jnp.float32)
    h = jnp.maximum(h + b[1:2, :], 0.0)
    h = jnp.dot(h, wp_ref[1], preferred_element_type=jnp.float32)
    h = jnp.maximum(h + b[2:3, :], 0.0)
    out = jnp.dot(h, wp_ref[2], preferred_element_type=jnp.float32) + b[3:4, :]

    # Only the first n_actions lanes carry data; write just those.
    o_ref[...] = out[:, :n_actions].astype(o_ref.dtype)
    # TODO(synk): optionally fuse epsilon-greedy argmax action selection here to
    # emit int32 actions directly; the module spec returns Q-values, so kept as-is.


def init_params(key, n_observations, n_nodes, n_actions):
    """PyTorch-style init; weights stored transposed as (in, out), biases (1, out)."""
    dims = [(n_observations, n_nodes), (n_nodes, n_nodes), (n_nodes, 20), (20, n_actions)]
    params = {}
    for i, (fan_in, fan_out) in enumerate(dims, start=1):
        key, kw, kb = jax.random.split(key, 3)
        bound = 1.0 / (fan_in ** 0.5)
        params[f"w{i}"] = jax.random.uniform(
            kw, (fan_in, fan_out), jnp.float32, minval=-bound, maxval=bound)
        params[f"b{i}"] = jax.random.uniform(
            kb, (1, fan_out), jnp.float32, minval=-bound, maxval=bound)
    return params


def pad_params(params):
    """Pack/zero-pad params for the kernel (exact math; do once, outside hot loop).

    Returns:
      w1: (n_observations, H)   first-layer weight, input dim left unpadded
      wp: (3, H, H)             layers 2..4 weights, zero-padded
      bp: (4, H)                all biases, zero-padded
    with H = round_up(max(hidden/out dims), 128) (= 128 for the default sizes).
    """
    n_obs = params["w1"].shape[0]
    dims_out = [params[f"w{i}"].shape[1] for i in range(1, 5)]
    dims_in = [params[f"w{i}"].shape[0] for i in range(1, 5)]
    H = _round_up(max(dims_out + dims_in[1:]), LANE)

    w1 = jnp.zeros((n_obs, H), jnp.float32).at[:, :dims_out[0]].set(params["w1"])

    wp = jnp.zeros((3, H, H), jnp.float32)
    for j, i in enumerate(range(2, 5)):
        w = params[f"w{i}"]
        wp = wp.at[j, :w.shape[0], :w.shape[1]].set(w)

    bp = jnp.zeros((4, H), jnp.float32)
    for i in range(1, 5):
        bi = params[f"b{i}"]
        bp = bp.at[i - 1, :bi.shape[1]].set(bi.reshape(-1))

    return {"w1": w1, "wp": wp, "bp": bp}


@partial(jax.jit, static_argnames=("n_actions",))
def dqn_4hl_2_forward(x, padded_params, n_actions):
    """x: (B, n_observations) fp32.  padded_params: output of pad_params()."""
    B, D = x.shape
    w1 = padded_params["w1"]
    wp = padded_params["wp"]
    bp = padded_params["bp"]
    H = w1.shape[1]

    # Batch tiling: derive the tile from the tile count so the trailing tile is
    # never nearly empty; force >=2 parallel steps for large batches (v7x 2 TCs).
    n_tiles = max(1, _ceil_div(B, MAX_BATCH_TILE))
    if n_tiles == 1 and B >= MIN_ROWS_FOR_SPLIT:
        n_tiles = 2
    tb = _round_up(_ceil_div(B, n_tiles), SUBLANE)
    b_p = n_tiles * tb

    # Pad batch rows only (cheap); feature dim stays at its natural width.
    x_p = x if b_p == B else jnp.pad(x, ((0, b_p - B), (0, 0)))

    out = pl.pallas_call(
        _dqn_kernel,
        out_shape=jax.ShapeDtypeStruct((b_p, n_actions), jnp.float32),
        grid=(n_tiles,),
        in_specs=[
            pl.BlockSpec((tb, D), lambda i: (i, 0)),        # x: streamed per tile
            pl.BlockSpec((D, H), lambda i: (0, 0)),         # w1: resident
            pl.BlockSpec((3, H, H), lambda i: (0, 0, 0)),   # w2..w4 packed: resident
            pl.BlockSpec((4, H), lambda i: (0, 0)),         # biases packed: resident
        ],
        out_specs=pl.BlockSpec((tb, n_actions), lambda i: (i, 0)),
        compiler_params=pltpu.CompilerParams(dimension_semantics=("parallel",)),
    )(x_p, w1, wp, bp)

    return out if b_p == B else out[:B]


def _ref_forward(x, params):
    h = jnp.maximum(x @ params["w1"] + params["b1"], 0.0)
    h = jnp.maximum(h @ params["w2"] + params["b2"], 0.0)
    h = jnp.maximum(h @ params["w3"] + params["b3"], 0.0)
    return h @ params["w4"] + params["b4"]


if __name__ == "__main__":
    key = jax.random.PRNGKey(0)
    n_observations, n_nodes, n_actions = 16, 32, 4

    k_x, k_p, k_big = jax.random.split(key, 3)
    params = init_params(k_p, n_observations, n_nodes, n_actions)
    padded_params = pad_params(params)

    # Small case matching the module spec (batch=2) -> single 8-row tile.
    x_small = jax.random.normal(k_x, (2, n_observations), jnp.float32)
    out_small = jax.block_until_ready(dqn_4hl_2_forward(x_small, padded_params, n_actions))
    exp_small = _ref_forward(x_small, params)
    assert out_small.shape == (2, n_actions)
    assert jnp.allclose(out_small, exp_small, atol=1e-5, rtol=1e-5)

    # Larger batch exercising the 2-step parallel grid (two 504-row tiles).
    x_big = jax.random.normal(k_big, (1000, n_observations), jnp.float32)
    out_big = jax.block_until_ready(dqn_4hl_2_forward(x_big, padded_params, n_actions))
    exp_big = _ref_forward(x_big, params)
    assert out_big.shape == (1000, n_actions)
    assert jnp.allclose(out_big, exp_big, atol=1e-4, rtol=1e-4)

    print("KERNEL_OK")
</pallas_src>

<mosaic_0001>
module attributes {stable_mosaic.version = 11 : i64} {
  func.func @_dqn_kernel(%arg0: i32, %arg1: memref<8x16xf32, #tpu.memory_space<vmem>>, %arg2: memref<16x128xf32, #tpu.memory_space<vmem>>, %arg3: memref<3x128x128xf32, #tpu.memory_space<vmem>>, %arg4: memref<4x128xf32, #tpu.memory_space<vmem>>, %arg5: memref<8x4xf32, #tpu.memory_space<vmem>>) attributes {dimension_semantics = [#tpu.dimension_semantics<parallel>], iteration_bounds = array<i64: 1>, scalar_prefetch = 0 : i64, scratch_operands = 0 : i64, tpu.core_type = #tpu.core_type<tc>, window_params = [{transform_indices = @transform_0, window_bounds = array<i64: 8, 16>}, {pipeline_mode = #tpu.pipeline_mode<synchronous>, transform_indices = @transform_1, window_bounds = array<i64: 16, 128>}, {pipeline_mode = #tpu.pipeline_mode<synchronous>, transform_indices = @transform_2, window_bounds = array<i64: 3, 128, 128>}, {pipeline_mode = #tpu.pipeline_mode<synchronous>, transform_indices = @transform_3, window_bounds = array<i64: 4, 128>}, {transform_indices = @transform_4, window_bounds = array<i64: 8, 4>}]} {
    %c0 = arith.constant 0 : index
    %c0_0 = arith.constant 0 : index
    %0 = vector.load %arg4[%c0, %c0_0] : memref<4x128xf32, #tpu.memory_space<vmem>>, vector<4x128xf32>
    %c0_1 = arith.constant 0 : index
    %c0_2 = arith.constant 0 : index
    %1 = vector.load %arg1[%c0_1, %c0_2] : memref<8x16xf32, #tpu.memory_space<vmem>>, vector<8x16xf32>
    %c0_3 = arith.constant 0 : index
    %c0_4 = arith.constant 0 : index
    %2 = vector.load %arg2[%c0_3, %c0_4] : memref<16x128xf32, #tpu.memory_space<vmem>>, vector<16x128xf32>
    %cst = arith.constant dense<0.000000e+00> : vector<8x128xf32>
    %3 = tpu.matmul %1, %2, %cst {dimension_numbers = #tpu.dot_dimension_numbers<[1], [0], [0], [1], [0, 0, 1, 1], [], []>} : vector<8x16xf32>, vector<16x128xf32>, vector<8x128xf32> -> vector<8x128xf32>
    %4 = vector.extract_strided_slice %0 {offsets = [0, 0], sizes = [1, 128], strides = [1, 1]} : vector<4x128xf32> to vector<1x128xf32>
    %5 = vector.broadcast %4 : vector<1x128xf32> to vector<8x128xf32>
    %6 = arith.addf %3, %5 : vector<8x128xf32>
    %cst_5 = arith.constant 0.000000e+00 : f32
    %7 = vector.broadcast %cst_5 : f32 to vector<8x128xf32>
    %8 = arith.maximumf %6, %7 : vector<8x128xf32>
    %c0_6 = arith.constant 0 : index
    %c0_7 = arith.constant 0 : index
    %c0_8 = arith.constant 0 : index
    %9 = vector.load %arg3[%c0_6, %c0_7, %c0_8] : memref<3x128x128xf32, #tpu.memory_space<vmem>>, vector<1x128x128xf32>
    %10 = vector.shape_cast %9 : vector<1x128x128xf32> to vector<128x128xf32>
    %cst_9 = arith.constant dense<0.000000e+00> : vector<8x128xf32>
    %11 = tpu.matmul %8, %10, %cst_9 {dimension_numbers = #tpu.dot_dimension_numbers<[1], [0], [0], [1], [0, 0, 1, 1], [], []>} : vector<8x128xf32>, vector<128x128xf32>, vector<8x128xf32> -> vector<8x128xf32>
    %12 = vector.extract_strided_slice %0 {offsets = [1, 0], sizes = [1, 128], strides = [1, 1]} : vector<4x128xf32> to vector<1x128xf32>
    %13 = vector.broadcast %12 : vector<1x128xf32> to vector<8x128xf32>
    %14 = arith.addf %11, %13 : vector<8x128xf32>
    %cst_10 = arith.constant 0.000000e+00 : f32
    %15 = vector.broadcast %cst_10 : f32 to vector<8x128xf32>
    %16 = arith.maximumf %14, %15 : vector<8x128xf32>
    %c1 = arith.constant 1 : index
    %c0_11 = arith.constant 0 : index
    %c0_12 = arith.constant 0 : index
    %17 = vector.load %arg3[%c1, %c0_11, %c0_12] : memref<3x128x128xf32, #tpu.memory_space<vmem>>, vector<1x128x128xf32>
    %18 = vector.shape_cast %17 : vector<1x128x128xf32> to vector<128x128xf32>
    %cst_13 = arith.constant dense<0.000000e+00> : vector<8x128xf32>
    %19 = tpu.matmul %16, %18, %cst_13 {dimension_numbers = #tpu.dot_dimension_numbers<[1], [0], [0], [1], [0, 0, 1, 1], [], []>} : vector<8x128xf32>, vector<128x128xf32>, vector<8x128xf32> -> vector<8x128xf32>
    %20 = vector.extract_strided_slice %0 {offsets = [2, 0], sizes = [1, 128], strides = [1, 1]} : vector<4x128xf32> to vector<1x128xf32>
    %21 = vector.broadcast %20 : vector<1x128xf32> to vector<8x128xf32>
    %22 = arith.addf %19, %21 : vector<8x128xf32>
    %cst_14 = arith.constant 0.000000e+00 : f32
    %23 = vector.broadcast %cst_14 : f32 to vector<8x128xf32>
    %24 = arith.maximumf %22, %23 : vector<8x128xf32>
    %c2 = arith.constant 2 : index
    %c0_15 = arith.constant 0 : index
    %c0_16 = arith.constant 0 : index
    %25 = vector.load %arg3[%c2, %c0_15, %c0_16] : memref<3x128x128xf32, #tpu.memory_space<vmem>>, vector<1x128x128xf32>
    %26 = vector.shape_cast %25 : vector<1x128x128xf32> to vector<128x128xf32>
    %cst_17 = arith.constant dense<0.000000e+00> : vector<8x128xf32>
    %27 = tpu.matmul %24, %26, %cst_17 {dimension_numbers = #tpu.dot_dimension_numbers<[1], [0], [0], [1], [0, 0, 1, 1], [], []>} : vector<8x128xf32>, vector<128x128xf32>, vector<8x128xf32> -> vector<8x128xf32>
    %28 = vector.extract_strided_slice %0 {offsets = [3, 0], sizes = [1, 128], strides = [1, 1]} : vector<4x128xf32> to vector<1x128xf32>
    %29 = vector.broadcast %28 : vector<1x128xf32> to vector<8x128xf32>
    %30 = arith.addf %27, %29 : vector<8x128xf32>
    %31 = vector.extract_strided_slice %30 {offsets = [0, 0], sizes = [8, 4], strides = [1, 1]} : vector<8x128xf32> to vector<8x4xf32>
    %c0_18 = arith.constant 0 : index
    %c0_19 = arith.constant 0 : index
    %32 = vector.load %arg5[%c0_18, %c0_19] : memref<8x4xf32, #tpu.memory_space<vmem>>, vector<8x4xf32>
    tpu.vector_store %arg5[%c0_18, %c0_19], %31 {strides = array<i32>} : memref<8x4xf32, #tpu.memory_space<vmem>>, vector<8x4xf32>,
    return
  }
  func.func @transform_0(%arg0: i32) -> (i32, i32) {
    %c0_i32 = arith.constant 0 : i32
    %c0_i32_0 = arith.constant 0 : i32
    return %arg0, %c0_i32 : i32, i32
  }
  func.func @transform_1(%arg0: i32) -> (i32, i32) {
    %c0_i32 = arith.constant 0 : i32
    %c0_i32_0 = arith.constant 0 : i32
    %c0_i32_1 = arith.constant 0 : i32
    return %c0_i32, %c0_i32_0 : i32, i32
  }
  func.func @transform_2(%arg0: i32) -> (i32, i32, i32) {
    %c0_i32 = arith.constant 0 : i32
    %c0_i32_0 = arith.constant 0 : i32
    %c0_i32_1 = arith.constant 0 : i32
    %c0_i32_2 = arith.constant 0 : i32
    return %c0_i32, %c0_i32_0, %c0_i32_1 : i32, i32, i32
  }
  func.func @transform_3(%arg0: i32) -> (i32, i32) {
    %c0_i32 = arith.constant 0 : i32
    %c0_i32_0 = arith.constant 0 : i32
    %c0_i32_1 = arith.constant 0 : i32
    return %c0_i32, %c0_i32_0 : i32, i32
  }
  func.func @transform_4(%arg0: i32) -> (i32, i32) {
    %c0_i32 = arith.constant 0 : i32
    %c0_i32_0 = arith.constant 0 : i32
    return %arg0, %c0_i32 : i32, i32
  }
}

</mosaic_0001>

<bundles_post_ra>
// kernel: dqn_4hl_2_forward.1
= control target key start
LH: loop header
LB: loop body
LE: loop exit
PB: predicated region body
PF: predicated region fallthrough
CT: control target
= control target key end

     0   :  { %9 = vsyncpa [#allocation3], 0  ;;  %s818_s0 = inlined_call_operand.vmem [shape: f32[8,16], index: 0, kind: input, shape index: {}]   ;;  %s819_s1 = inlined_call_operand.vmem [shape: f32[16,128], index: 1, kind: input, shape index: {}]   ;;  %s820_s2 = inlined_call_operand.hbm [shape: f32[3,128,128], index: 2, kind: input, shape index: {}]   ;;  %s821_s3 = inlined_call_operand.hbm [shape: f32[4,128], index: 3, kind: input, shape index: {}]   ;;  %s822_s4 = inlined_call_operand.vmem [shape: f32[8,4], index: 4, kind: output, shape index: {}]  }
   0x1   :  { %10 = vsyncpa [#allocation5], 0  ;;  %s705_s15 = smov [#allocation2]   ;;  %s657_s19 = scalar_lea.hbm %s820_s2, 6144 }
   0x2   :  { %s20_s16 = sshll.u32 %s705_s15, 4  ;;  %p658_p0 = scmp.ne.s32.totalorder %s820_s2, %s657_s19  ;;  %s21_s16 = int_to_ptr.vmem [resolvable:$true] %s20_s16 }
   0x3   :  { %p661_p1 = scmp.lt.u32.totalorder %s657_s19, %s820_s2 }
   0x5   :  { %p663_p2 = pnand %p661_p1, %p658_p0 }
   0x7   :  { %666 = shalt.err (!%p663_p2)
}
   0x8   :  { %s667_s24 = scalar_lea.vmem %s21_s16, 6144  ;;  %p672_p4 = scmp.lt.s32.totalorder %s21_s16, %s21_s16 }
   0x9   :  { %p668_p3 = scmp.ne.s32.totalorder %s21_s16, %s667_s24  ;;  %p673_p5 = scmp.lt.s32.totalorder %s667_s24, %s667_s24 }
   0xb   :  { %p674_p6 = por %p673_p5, %p672_p4 }
   0xd   :  { %p675_p7 = pnand %p674_p6, %p668_p3 }
   0xf   :  { %678 = shalt.err (!%p675_p7)
}
  0x10   :  { %s706_s25 = smov 128   ;;  %s707_s26 = smov 8  }
  0x11   :  { %26 = dma.hbm_to_vmem [thread:$0]  %s820_s2, 6144, %s21_s16, [#allocation3], %s706_s25, %s706_s25, %s707_s26  }
  0x12   :  { %s708_s29 = smov [#allocation4]   ;;  %s679_s7 = scalar_lea.hbm %s821_s3, 64 }
  0x13   :  { %s33_s30 = sshll.u32 %s708_s29, 4  ;;  %p680_p8 = scmp.ne.s32.totalorder %s821_s3, %s679_s7  ;;  %s34_s30 = int_to_ptr.vmem [resolvable:$true] %s33_s30 }
  0x14   :  { %p683_p9 = scmp.lt.u32.totalorder %s679_s7, %s821_s3 }
  0x16   :  { %p685_p10 = pnand %p683_p9, %p680_p8 }
  0x18   :  { %688 = shalt.err (!%p685_p10)
}
  0x19   :  { %s689_s12 = scalar_lea.vmem %s34_s30, 64  ;;  %p694_p12 = scmp.lt.s32.totalorder %s34_s30, %s34_s30 }
  0x1a   :  { %p690_p11 = scmp.ne.s32.totalorder %s34_s30, %s689_s12  ;;  %p695_p13 = scmp.lt.s32.totalorder %s689_s12, %s689_s12 }
  0x1c   :  { %p696_p0 = por %p695_p13, %p694_p12 }
  0x1e   :  { %p697_p1 = pnand %p696_p0, %p690_p11 }
  0x20   :  { %700 = shalt.err (!%p697_p1)
}
  0x21   :  { %36 = dma.hbm_to_vmem [thread:$0]  %s821_s3, 64, %s34_s30, [#allocation5]  }
  0x22   :  { %701 = dma.done.wait [#allocation3], 6144  }
  0x23   :  { %702 = vsyncadd [#allocation3], 4294961152 }
  0x24   :  { %703 = dma.done.wait [#allocation5], 64  }
  0x25   :  { %704 = vsyncadd [#allocation5], 4294967232  ;;  %v709_v0 = vmov 0.0|0.0   ;;  %vm710_vm0 = vmmov 0   ;;  %v711_v1 = vmov 0.0   ;;  %v45_v2 = vld [vmem:[%s819_s1] sm:$0xff]  ;;  %v47_v51 = vlaneseq }
  0x26   :  { %575 = vmatprep.subr.bf16.mxu0 %v709_v0  ;;  %467 = vmatprep.mubr.msk.f32.mxu0 %vm710_vm0, %v711_v1  ;;  %v46_v3 = vld [vmem:[%s819_s1 + $0x8] sm:$0xff]  ;;  %v126_v5 = vld [vmem:[#allocation2] sm:$0xff]  ;;  %v127_v6 = vld [vmem:[#allocation2 + $0x8] sm:$0xff]  ;;  %vm51_vm1 = vcmask 130048   ;;  %vm400_vm2 = vcmask 31744  }
  0x27   :  { %578 = vmatprep.subr.bf16.mxu1 %v709_v0  ;;  %502 = vmatprep.mubr.msk.f32.mxu1 %vm710_vm0, %v711_v1  ;;  %v576_v4 = vpack.c.bf16 %v46_v3, %v45_v2  ;;  %v128_v7 = vld [vmem:[#allocation2 + $0x10] sm:$0xff]  ;;  %v579_v8 = vpack.c.bf16 %v127_v6, %v126_v5  ;;  %v129_v9 = vld [vmem:[#allocation2 + $0x18] sm:$0xff]  ;;  %v130_v12 = vld [vmem:[#allocation2 + $0x20] sm:$0xff]  ;;  %v794_v52 = vshrl.u32 %v47_v51, 7 }
  0x28   :  { %v44_v10 = vld [vmem:[%s818_s0] sm:$0xff]  ;;  %v582_v11 = vpack.c.bf16 %v129_v9, %v128_v7  ;;  %v131_v13 = vld [vmem:[#allocation2 + $0x28] sm:$0xff]  ;;  %v133_v16 = vld [vmem:[#allocation2 + $0x38] sm:$0xff] }
  0x29   :  { %577 = vmatpush3.bf16.msra.mxu0 %v576_v4  ;;  %580 = vmatpush3.bf16.msra.mxu1 %v579_v8  ;;  %v585_v14 = vpack.c.bf16 %v131_v13, %v130_v12  ;;  %v132_v15 = vld [vmem:[#allocation2 + $0x30] sm:$0xff]  ;;  %v134_v18 = vld [vmem:[#allocation2 + $0x40] sm:$0xff]  ;;  %v135_v19 = vld [vmem:[#allocation2 + $0x48] sm:$0xff]  ;;  %v49_v53 = vsub.s32 0, %v794_v52 }
  0x2a   :  { %602 = vmatprep.subr.bf16.mxu0 %v709_v0  ;;  %581 = vmatprep.subr.bf16.mxu1 %v709_v0  ;;  %v588_v17 = vpack.c.bf16 %v133_v16, %v132_v15  ;;  %v591_v20 = vpack.c.bf16 %v135_v19, %v134_v18  ;;  %v136_v21 = vld [vmem:[#allocation2 + $0x50] sm:$0xff]  ;;  %v137_v22 = vld [vmem:[#allocation2 + $0x58] sm:$0xff]  ;;  %v138_v24 = vld [vmem:[#allocation2 + $0x60] sm:$0xff] }
  0x2b   :  { %v594_v23 = vpack.c.bf16 %v137_v22, %v136_v21  ;;  %v139_v25 = vld [vmem:[#allocation2 + $0x68] sm:$0xff]  ;;  %v140_v27 = vld [vmem:[#allocation2 + $0x70] sm:$0xff]  ;;  %v141_v28 = vld [vmem:[#allocation2 + $0x78] sm:$0xff]  ;;  %v144_v21 = vsub.s32 1, %v794_v52 }
  0x2c   :  { %468 = vmatmul.mubr.msk.f32.vlgmr.msra.gmra.mrb[0].mxu0 %vm51_vm1, %v44_v10  ;;  %v597_v26 = vpack.c.bf16 %v139_v25, %v138_v24  ;;  %v600_v29 = vpack.c.bf16 %v141_v28, %v140_v27  ;;  %v218_v30 = vld [vmem:[#allocation2 + $0x80] sm:$0xff]  ;;  %v219_v31 = vld [vmem:[#allocation2 + $0x88] sm:$0xff]  ;;  %v220_v32 = vld [vmem:[#allocation2 + $0x90] sm:$0xff] }
  0x2d   :  { %537 = vmatprep.mubr.msk.f32.mxu0 %vm710_vm0, %v711_v1  ;;  %583 = vmatpush3.bf16.msra.mxu1 %v582_v11  ;;  %v603_v33 = vpack.c.bf16 %v219_v31, %v218_v30  ;;  %v221_v34 = vld [vmem:[#allocation2 + $0x98] sm:$0xff]  ;;  %v222_v36 = vld [vmem:[#allocation2 + $0xa0] sm:$0xff]  ;;  %v223_v37 = vld [vmem:[#allocation2 + $0xa8] sm:$0xff]  ;;  %v236_v30 = vsub.s32 2, %v794_v52 }
  0x2e   :  { %584 = vmatprep.subr.bf16.mxu1 %v709_v0  ;;  %v606_v35 = vpack.c.bf16 %v221_v34, %v220_v32  ;;  %v609_v38 = vpack.c.bf16 %v223_v37, %v222_v36  ;;  %v224_v39 = vld [vmem:[#allocation2 + $0xb0] sm:$0xff]  ;;  %v225_v40 = vld [vmem:[#allocation2 + $0xb8] sm:$0xff]  ;;  %v226_v42 = vld [vmem:[#allocation2 + $0xc0] sm:$0xff] }
  0x2f   :  { %604 = vmatpush3.bf16.msra.mxu0 %v603_v33  ;;  %v612_v41 = vpack.c.bf16 %v225_v40, %v224_v39  ;;  %v227_v43 = vld [vmem:[#allocation2 + $0xc8] sm:$0xff]  ;;  %v228_v45 = vld [vmem:[#allocation2 + $0xd0] sm:$0xff]  ;;  %v229_v46 = vld [vmem:[#allocation2 + $0xd8] sm:$0xff] }
  0x30   :  { %605 = vmatprep.subr.bf16.mxu0 %v709_v0  ;;  %v615_v44 = vpack.c.bf16 %v227_v43, %v226_v42  ;;  %v618_v47 = vpack.c.bf16 %v229_v46, %v228_v45  ;;  %v230_v48 = vld [vmem:[#allocation2 + $0xe0] sm:$0xff]  ;;  %v231_v49 = vld [vmem:[#allocation2 + $0xe8] sm:$0xff]  ;;  %v232_v60 = vld [vmem:[#allocation2 + $0xf0] sm:$0xff] }
  0x31   :  { %586 = vmatpush3.bf16.msra.mxu1 %v585_v14  ;;  %v621_v50 = vpack.c.bf16 %v231_v49, %v230_v48  ;;  %v797_v54 = vld [vmem:[#allocation4] sm:$0xf]  ;;  %v233_v61 = vld [vmem:[#allocation2 + $0xf8] sm:$0xff]  ;;  %v311_v2 = vld [vmem:[#allocation2 + $0x108] sm:$0xff] }
  0x32   :  { %587 = vmatprep.subr.bf16.mxu1 %v709_v0  ;;  %v50_v55 = vrot.slane %v797_v54, %v49_v53  ;;  %v624_v62 = vpack.c.bf16 %v233_v61, %v232_v60  ;;  %v310_v63 = vld [vmem:[#allocation2 + $0x100] sm:$0xff]  ;;  %v312_v3 = vld [vmem:[#allocation2 + $0x110] sm:$0xff]  ;;  %v313_v5 = vld [vmem:[#allocation2 + $0x118] sm:$0xff]  ;;  %v145_v22 = vrot.slane %v797_v54, %v144_v21  ;;  %v237_v31 = vrot.slane %v797_v54, %v236_v30 }
  0x33   :  { %607 = vmatpush3.bf16.msra.mxu0 %v606_v35  ;;  %v627_v4 = vpack.c.bf16 %v311_v2, %v310_v63  ;;  %v630_v6 = vpack.c.bf16 %v313_v5, %v312_v3  ;;  %v314_v7 = vld [vmem:[#allocation2 + $0x120] sm:$0xff]  ;;  %v315_v8 = vld [vmem:[#allocation2 + $0x128] sm:$0xff]  ;;  %v317_v10 = vld [vmem:[#allocation2 + $0x138] sm:$0xff]  ;;  %v328_v35 = vsub.s32 3, %v794_v52 }
  0x34   :  { %608 = vmatprep.subr.bf16.mxu0 %v709_v0  ;;  %v633_v9 = vpack.c.bf16 %v315_v8, %v314_v7  ;;  %v318_v12 = vld [vmem:[#allocation2 + $0x140] sm:$0xff]  ;;  %v319_v13 = vld [vmem:[#allocation2 + $0x148] sm:$0xff]  ;;  %v320_v15 = vld [vmem:[#allocation2 + $0x150] sm:$0xff] }
  0x35   :  { %589 = vmatpush3.bf16.msra.mxu1 %v588_v17  ;;  %v639_v14 = vpack.c.bf16 %v319_v13, %v318_v12  ;;  %v321_v16 = vld [vmem:[#allocation2 + $0x158] sm:$0xff]  ;;  %v322_v18 = vld [vmem:[#allocation2 + $0x160] sm:$0xff]  ;;  %v323_v19 = vld [vmem:[#allocation2 + $0x168] sm:$0xff]  ;;  %v329_v36 = vrot.slane %v797_v54, %v328_v35 }
  0x36   :  { %590 = vmatprep.subr.bf16.mxu1 %v709_v0  ;;  %v642_v17 = vpack.c.bf16 %v321_v16, %v320_v15  ;;  %v324_v27 = vld [vmem:[#allocation2 + $0x170] sm:$0xff]  ;;  %v325_v28 = vld [vmem:[#allocation2 + $0x178] sm:$0xff] }
  0x37   :  { %610 = vmatpush3.bf16.msra.mxu0 %v609_v38 }
  0x38   :  { %611 = vmatprep.subr.bf16.mxu0 %v709_v0 }
  0x39   :  { %592 = vmatpush3.bf16.msra.mxu1 %v591_v20  ;;  %v645_v20 = vpack.c.bf16 %v323_v19, %v322_v18 }
  0x3a   :  { %593 = vmatprep.subr.bf16.mxu1 %v709_v0 }
  0x3b   :  { %613 = vmatpush3.bf16.msra.mxu0 %v612_v41 }
  0x3c   :  { %614 = vmatprep.subr.bf16.mxu0 %v709_v0 }
  0x3d   :  { %595 = vmatpush3.bf16.msra.mxu1 %v594_v23 }
  0x3e   :  { %596 = vmatprep.subr.bf16.mxu1 %v709_v0 }
  0x3f   :  { %616 = vmatpush3.bf16.msra.mxu0 %v615_v44 }
  0x40   :  { %617 = vmatprep.subr.bf16.mxu0 %v709_v0 }
  0x41   :  { %598 = vmatpush3.bf16.msra.mxu1 %v597_v26 }
  0x42   :  { %599 = vmatprep.subr.bf16.mxu1 %v709_v0 }
  0x43   :  { %619 = vmatpush3.bf16.msra.mxu0 %v618_v47 }
  0x44   :  { %620 = vmatprep.subr.bf16.mxu0 %v709_v0 }
  0x45   :  { %601 = vmatpush3.bf16.msra.mxu1 %v600_v29  ;;  %v648_v29 = vpack.c.bf16 %v325_v28, %v324_v27 }
  0x46   :  { %626 = vmatprep.subr.bf16.mxu1 %v709_v0 }
  0x47   :  { %622 = vmatpush3.bf16.msra.mxu0 %v621_v50 }
  0x48   :  { %623 = vmatprep.subr.bf16.mxu0 %v709_v0 }
  0x4b   :  { %625 = vmatpush3.bf16.msra.mxu0 %v624_v62 }
  0xff   :  { %v121_v56 = vpop.f32.mrb[0].mxu0 }
 0x100   :  { %v122_v57 = vadd.f32 %v121_v56, %v50_v55  ;;  %v469_v58 = vpop.f32.mrb[1].mxu0 }
 0x102   :  { %v125_v59 = vmax.f32 %v122_v57, 0.0 }
 0x104   :  { %503 = vmatmul.mubr.f32.vlgmr.msra.gmra.mrb[0].mxu1 %v125_v59 }
 0x105   :  { %572 = vmatprep.mubr.msk.f32.mxu1 %vm710_vm0, %v711_v1  ;;  %628 = vmatpush3.bf16.msra.mxu1 %v627_v4  ;;  %v316_v1 = vld [vmem:[#allocation2 + $0x130] sm:$0xff] }
 0x106   :  { %629 = vmatprep.subr.bf16.mxu1 %v709_v0  ;;  %v636_v11 = vpack.c.bf16 %v317_v10, %v316_v1 }
 0x109   :  { %631 = vmatpush3.bf16.msra.mxu1 %v630_v6 }
 0x10a   :  { %632 = vmatprep.subr.bf16.mxu1 %v709_v0 }
 0x10d   :  { %634 = vmatpush3.bf16.msra.mxu1 %v633_v9 }
 0x10e   :  { %635 = vmatprep.subr.bf16.mxu1 %v709_v0 }
 0x111   :  { %637 = vmatpush3.bf16.msra.mxu1 %v636_v11 }
 0x112   :  { %638 = vmatprep.subr.bf16.mxu1 %v709_v0 }
 0x115   :  { %640 = vmatpush3.bf16.msra.mxu1 %v639_v14 }
 0x116   :  { %641 = vmatprep.subr.bf16.mxu1 %v709_v0 }
 0x119   :  { %643 = vmatpush3.bf16.msra.mxu1 %v642_v17 }
 0x11a   :  { %644 = vmatprep.subr.bf16.mxu1 %v709_v0 }
 0x11d   :  { %646 = vmatpush3.bf16.msra.mxu1 %v645_v20 }
 0x11e   :  { %647 = vmatprep.subr.bf16.mxu1 %v709_v0 }
 0x121   :  { %649 = vmatpush3.bf16.msra.mxu1 %v648_v29 }
 0x1d7   :  { %v212_v23 = vpop.f32.mrb[0].mxu1 }
 0x1d8   :  { %v213_v24 = vadd.f32 %v212_v23, %v145_v22  ;;  %v504_v25 = vpop.f32.mrb[1].mxu1 }
 0x1da   :  { %v216_v26 = vmax.f32 %v213_v24, 0.0 }
 0x1dc   :  { %538 = vmatmul.mubr.f32.vlgmr.msra.gmra.mrb[2].mxu0 %v216_v26 }
 0x2af   :  { %v304_v32 = vpop.f32.mrb[2].mxu0 }
 0x2b0   :  { %v305_v33 = vadd.f32 %v304_v32, %v237_v31  ;;  %v539_v0 = vpop.f32.mrb[3].mxu0 }
 0x2b2   :  { %v308_v34 = vmax.f32 %v305_v33, 0.0 }
 0x2b4   :  { %573 = vmatmul.mubr.f32.vlgmr.msra.gmra.mrb[2].mxu1 %v308_v34 }
 0x387   :  { %v396_v37 = vpop.f32.mrb[2].mxu1 }
 0x388   :  { %v397_v38 = vadd.f32 %v396_v37, %v329_v36  ;;  %v574_v39 = vpop.f32.mrb[3].mxu1 }
 0x38a   :  { %401 = vst.msk [vmem:[%s822_s4] sm:$0xff] %vm400_vm2, %v397_v38 }
 0x38b   :  { %406 = vsyncpa [#allocation3], 1 }
 0x38c   :  { %407 = vsyncpa [#allocation5], 1 }

</bundles_post_ra>
